<compile_context>
chip_gen: v7x
topology: tpu7x:2x2x1
jax: 0.10.0
libtpu: 0.0.40
codegen_flags: <defaults>
</compile_context>

<pallas_src>
import functools

import jax
import jax.numpy as jnp
import numpy as np
from jax.experimental import pallas as pl
from jax.experimental.pallas import tpu as pltpu


_MAX_GATHER_LANES = 128  # keep each lane gather within a single vreg's lanes


def _pixel_shuffle_1d_kernel(idx_ref, x_ref, o_ref, *, r, wc):
    """One (batch, H-tile) grid step. Pure data movement, native dtype.

    idx_ref: (1, r*wc) int32 -- static gather map for one output lane chunk.
    x_ref:   (1, C, TH, W)
    o_ref:   (1, C//r, TH, W*r)
    """
    if r == 1:  # identity shuffle
        o_ref[...] = x_ref[...]
        return

    _, C, TH, W = x_ref.shape
    cl = C // r
    Wl = W * r
    G = r * wc            # output lanes produced per gather chunk
    M = cl * TH           # rows processed together

    x = x_ref[0]          # (C, TH, W), native dtype (no f32 upcast/acc)

    # Channel groups, collapsed to 2-D (rows = (c, th), cols = W). Only the
    # leading/sublane dims are merged; the minor (lane) dim is untouched.
    groups = [x[u * cl:(u + 1) * cl].reshape(M, W) for u in range(r)]

    # Static gather indices, hoisted out of the chunk loop.
    idx = jnp.broadcast_to(idx_ref[...], (M, G))

    # For each <=128-lane output chunk: concatenate the r groups' width slices
    # along lanes, then one lane gather produces the interleave
    #   out[:, w*r + u] = groups[u][:, w]
    chunks = []
    for c0 in range(0, W, wc):
        z = jnp.concatenate([g[:, c0:c0 + wc] for g in groups], axis=-1)  # (M, G)
        chunks.append(jnp.take_along_axis(z, idx, axis=-1))               # (M, G)
    out2d = chunks[0] if len(chunks) == 1 else jnp.concatenate(chunks, axis=-1)

    o_ref[...] = out2d.reshape(1, cl, TH, Wl)


def _choose_wc(W, r):
    """Input-width chunk so that r*wc (gather width) stays within 128 lanes."""
    if r * W <= _MAX_GATHER_LANES:
        return W
    best = None
    for wc in range(1, W + 1):
        if W % wc == 0 and r * wc <= _MAX_GATHER_LANES:
            best = wc
    return best if best is not None else W


def _choose_th(H, C, W, itemsize, tile_budget_bytes=4 << 20):
    """Largest H tile (multiple of 8, dividing H) with ~tile_budget working set.

    Working set per step ~= 2 * (in_tile + out_tile) = 4 * C * TH * W * itemsize
    (input + equally-sized output, double buffered by the Pallas pipeline).
    """
    def cost(th):
        return 4 * C * th * W * itemsize

    if cost(H) <= tile_budget_bytes:
        return H
    best = None
    th = 8
    while th < H:
        if H % th == 0 and cost(th) <= tile_budget_bytes:
            best = th
        th += 8
    if best is not None:
        return best
    th = 8
    while th < H:                 # over budget, but smallest legal tile
        if H % th == 0:
            return th
        th += 8
    return H


def pixel_shuffle_1d(x, upscale_factor):
    B, C, H, W = x.shape
    r = int(upscale_factor)
    assert C % r == 0, "channels must be divisible by upscale_factor"
    cl = C // r
    Wl = W * r
    itemsize = jnp.dtype(x.dtype).itemsize

    TH = _choose_th(H, C, W, itemsize)
    wc = _choose_wc(W, r)
    G = r * wc

    # Static gather map for one G-wide output chunk:
    # output lane j reads concatenated-source lane (j % r) * wc + j // r.
    j = np.arange(G, dtype=np.int32)
    idx = jnp.asarray(((j % r) * wc + j // r).reshape(1, G))

    kernel = functools.partial(_pixel_shuffle_1d_kernel, r=r, wc=wc)

    tile_pair_bytes = (C * TH * W + cl * TH * Wl) * itemsize
    vmem_limit = int(min(48 << 20, max(8 << 20, 6 * tile_pair_bytes)))

    return pl.pallas_call(
        kernel,
        out_shape=jax.ShapeDtypeStruct((B, cl, H, Wl), x.dtype),
        grid_spec=pltpu.PrefetchScalarGridSpec(
            num_scalar_prefetch=0,
            grid=(B, H // TH),
            in_specs=[
                pl.BlockSpec((1, G), lambda b, h: (0, 0)),           # gather map
                pl.BlockSpec((1, C, TH, W), lambda b, h: (b, 0, h, 0)),
            ],
            out_specs=pl.BlockSpec((1, cl, TH, Wl), lambda b, h: (b, 0, h, 0)),
        ),
        compiler_params=pltpu.CompilerParams(
            dimension_semantics=("parallel", "parallel"),
            vmem_limit_bytes=vmem_limit,
        ),
        cost_estimate=pl.CostEstimate(
            flops=0,
            transcendentals=0,
            bytes_accessed=2 * x.size * itemsize,
        ),
    )(idx, x)


def _reference_pixel_shuffle_1d(x, r):
    # Pure-JAX reference mirroring the PyTorch view/permute/view exactly.
    B, C, H, W = x.shape
    cl = C // r
    y = x.reshape(B, r, cl, H, W)
    y = jnp.transpose(y, (0, 2, 3, 4, 1))
    return y.reshape(B, cl, H, r * W)


if __name__ == "__main__":
    key = jax.random.PRNGKey(0)
    # Small NCHW shapes consistent with the module; W chosen so the output
    # block (W*r = 128 lanes) is lane-dense and the gather spans one vreg.
    B, C, H, W = 2, 4, 16, 64
    r = 2
    x = jax.random.normal(key, (B, C, H, W), dtype=jnp.float32)

    out = jax.block_until_ready(pixel_shuffle_1d(x, upscale_factor=r))

    ref = _reference_pixel_shuffle_1d(x, r)
    assert out.shape == (B, C // r, H, r * W), out.shape
    assert out.dtype == x.dtype
    # Pure data movement in native dtype -> results must match bit-exactly.
    assert bool(jnp.array_equal(out, ref)), "mismatch vs reference"

    print("KERNEL_OK")
</pallas_src>

<mosaic_0001>
module attributes {stable_mosaic.version = 11 : i64} {
  func.func @_pixel_shuffle_1d_kernel(%arg0: i32, %arg1: i32, %arg2: memref<1x128xi32, #tpu.memory_space<vmem>>, %arg3: memref<1x4x16x64xf32, #tpu.memory_space<vmem>>, %arg4: memref<1x2x16x128xf32, #tpu.memory_space<vmem>>) attributes {dimension_semantics = [#tpu.dimension_semantics<parallel>, #tpu.dimension_semantics<parallel>], iteration_bounds = array<i64: 2, 1>, scalar_prefetch = 0 : i64, scratch_operands = 0 : i64, tpu.core_type = #tpu.core_type<tc>, window_params = [{pipeline_mode = #tpu.pipeline_mode<synchronous>, transform_indices = @transform_0, window_bounds = array<i64: 1, 128>}, {transform_indices = @transform_1, window_bounds = array<i64: 1, 4, 16, 64>}, {transform_indices = @transform_2, window_bounds = array<i64: 1, 2, 16, 128>}]} {
    %c0 = arith.constant 0 : index
    %c0_0 = arith.constant 0 : index
    %c0_1 = arith.constant 0 : index
    %c0_2 = arith.constant 0 : index
    %0 = vector.load %arg3[%c0, %c0_0, %c0_1, %c0_2] : memref<1x4x16x64xf32, #tpu.memory_space<vmem>>, vector<1x4x16x64xf32>
    %1 = vector.shape_cast %0 : vector<1x4x16x64xf32> to vector<4x16x64xf32>
    %2 = vector.extract_strided_slice %1 {offsets = [0, 0, 0], sizes = [2, 16, 64], strides = [1, 1, 1]} : vector<4x16x64xf32> to vector<2x16x64xf32>
    %3 = vector.shape_cast %2 : vector<2x16x64xf32> to vector<32x64xf32>
    %4 = vector.extract_strided_slice %1 {offsets = [2, 0, 0], sizes = [2, 16, 64], strides = [1, 1, 1]} : vector<4x16x64xf32> to vector<2x16x64xf32>
    %5 = vector.shape_cast %4 : vector<2x16x64xf32> to vector<32x64xf32>
    %c0_3 = arith.constant 0 : index
    %c0_4 = arith.constant 0 : index
    %6 = vector.load %arg2[%c0_3, %c0_4] : memref<1x128xi32, #tpu.memory_space<vmem>>, vector<1x128xi32>
    %7 = vector.shape_cast %6 : vector<1x128xi32> to vector<1x128xi32>
    %8 = vector.broadcast %7 : vector<1x128xi32> to vector<32x128xi32>
    %9 = tpu.concatenate %3, %5 in 1 : vector<32x64xf32>, vector<32x64xf32> -> vector<32x128xf32>
    %c0_i32 = arith.constant 0 : i32
    %10 = vector.broadcast %c0_i32 : i32 to vector<32x128xi32>
    %11 = arith.cmpi slt, %8, %10 : vector<32x128xi32>
    %c128_i32 = arith.constant 128 : i32
    %12 = vector.broadcast %c128_i32 : i32 to vector<32x128xi32>
    %13 = arith.addi %8, %12 : vector<32x128xi32>
    %14 = arith.select %11, %13, %8 : vector<32x128xi1>, vector<32x128xi32>
    %15 = vector.shape_cast %14 : vector<32x128xi32> to vector<32x128x1xi32>
    %16 = vector.shape_cast %15 : vector<32x128x1xi32> to vector<32x128xi32>
    %17 = tpu.dynamic_gather %9[%16] in [1] : vector<32x128xf32>, vector<32x128xi32> -> vector<32x128xf32>
    %18 = vector.shape_cast %17 : vector<32x128xf32> to vector<1x2x16x128xf32>
    %c0_5 = arith.constant 0 : index
    %c0_6 = arith.constant 0 : index
    %c0_7 = arith.constant 0 : index
    %c0_8 = arith.constant 0 : index
    %19 = vector.load %arg4[%c0_5, %c0_6, %c0_7, %c0_8] : memref<1x2x16x128xf32, #tpu.memory_space<vmem>>, vector<1x2x16x128xf32>
    tpu.vector_store %arg4[%c0_5, %c0_6, %c0_7, %c0_8], %18 {strides = array<i32>} : memref<1x2x16x128xf32, #tpu.memory_space<vmem>>, vector<1x2x16x128xf32>,
    return
  }
  func.func @transform_0(%arg0: i32, %arg1: i32) -> (i32, i32) {
    %c0_i32 = arith.constant 0 : i32
    %c0_i32_0 = arith.constant 0 : i32
    %c0_i32_1 = arith.constant 0 : i32
    return %c0_i32, %c0_i32_0 : i32, i32
  }
  func.func @transform_1(%arg0: i32, %arg1: i32) -> (i32, i32, i32, i32) {
    %c0_i32 = arith.constant 0 : i32
    %c0_i32_0 = arith.constant 0 : i32
    %c0_i32_1 = arith.constant 0 : i32
    return %arg0, %c0_i32, %arg1, %c0_i32_0 : i32, i32, i32, i32
  }
  func.func @transform_2(%arg0: i32, %arg1: i32) -> (i32, i32, i32, i32) {
    %c0_i32 = arith.constant 0 : i32
    %c0_i32_0 = arith.constant 0 : i32
    %c0_i32_1 = arith.constant 0 : i32
    return %arg0, %c0_i32, %arg1, %c0_i32_0 : i32, i32, i32, i32
  }
}

</mosaic_0001>

<bundles_post_ra>
// kernel: tpu_custom_call.1
= control target key start
LH: loop header
LB: loop body
LE: loop exit
PB: predicated region body
PF: predicated region fallthrough
CT: control target
= control target key end

     0   :  { %7 = vsyncpa [#allocation3], 0  ;;  %s868_s0 = inlined_call_operand.hbm [shape: s32[1,128], index: 0, kind: input, shape index: {}]   ;;  %s869_s1 = inlined_call_operand.hbm [shape: f32[2,4,16,64], index: 1, kind: input, shape index: {}]   ;;  %s870_s2 = inlined_call_operand.hbm [shape: f32[2,2,16,128], index: 2, kind: output, shape index: {}]  }
   0x1   :  { %8 = vsyncpa [#allocation6], 0 }
   0x2   :  { %10 = vsyncpa [#allocation6 + $0x1], 0 }
   0x3   :  { %11 = vsyncpa [#allocation4], 0 }
   0x4   :  { %13 = vsyncpa [#allocation4 + $0x1], 0  ;;  %s632_s9 = smov 0   ;;  %s634_s10 = smov 0  }
   0x5   :  { %s636_s11 = smov 0   ;;  %s638_s12 = smov 0  }
   0x6   :  { %s640_s13 = smov 0   ;;  %s642_s14 = smov 0  }
   0x7 LB: > { %s363_s15 = sadd.s32 4294967295, %s607_s14   ;;  %s364_s16 = sadd.s32 4294967294, %s607_s14   ;;  %s607_s14 = sphi %s642_s14, %s19_s14   ;;  %s603_s13 = sphi %s640_s13, %s898_s13   ;;  %s599_s12 = sphi %s638_s12, %s897_s12   ;;  %s595_s11 = sphi %s636_s11, %s896_s11   ;;  %s591_s10 = sphi %s634_s10, %s895_s10   ;;  %s587_s9 = sphi %s632_s9, %s894_s9  }
   0x8   : > { %s61_s17 = sadd.s32 1, %s595_s11  ;;  %p68_p0 = scmp.ne.s32.totalorder %s595_s11, %s591_s10 }
   0x9   : > { %p69_p1 = scmp.eq.s32.totalorder %s607_s14, 0  ;;  %p74_p2 = scmp.ne.s32.totalorder %s591_s10, %s587_s9 }
   0xa   : > { %p670_p3 = scmp.eq.s32.totalorder %s363_s15, 0  ;;  %p100_p4 = scmp.eq.s32.totalorder %s363_s15, 1 }
   0xb   : > { %p674_p5 = por %p69_p1, %p68_p0  ;;  %p106_p6 = scmp.eq.s32.totalorder %s364_s16, 1 }
   0xc   : > { %s877_s18 = scalar_select %p670_p3, 1, 0 }
   0xd   : > { %p680_p7 = por %p670_p3, %p74_p2  ;;  %p684_p8 = por %p100_p4, %p68_p0 }
   0xe   : > { %p688_p9 = por %p106_p6, %p74_p2  ;;  %p365_p10 = scmp.ge.s32.totalorder %s607_s14, 1 }
   0xf   : > { %s879_s20 = scalar_select %p680_p7, 1, 0 }
  0x10   : > { %s880_s21 = scalar_select %p684_p8, 1, 0 }
  0x11   : > { %s881_s22 = scalar_select %p688_p9, 1, 0 }
  0x12   : > { %p113_p11 = scmp.lt.s32.totalorder %s607_s14, 3  ;;  %s609_s24 = smov [#allocation2]  }
  0x13   : > { %s126_s25 = sshll.u32 %s609_s24, 4  ;;  %p404_p1 = scmp.lt.s32.totalorder %s607_s14, 2  ;;  %s127_s25 = int_to_ptr.vmem [resolvable:$true] %s126_s25 }
  0x14   : > { %p695_p13 = pnand %p365_p10, %p113_p11  ;;  %s31_s28 = sadd.s32 1, %s603_s13 }
  0x15   : > { %p704_p4 = pnand %p404_p1, %p674_p5  ;;  %p715_p6 = scmp.ge.s32.totalorder %s31_s28, 2 }
  0x16   : > { %s882_s23 = scalar_select %p695_p13, 1, 0 }
  0x17   : > { %p391_p0 = pneg %p695_p13  ;;  %s137_s30 = sand.u32 1, %s595_s11  }
  0x18   : > { %s883_s26 = scalar_select %p704_p4, 1, 0 }
  0x19   : > { %p710_p2 = pnand %p391_p0, %p670_p3  ;;  %s463_s5 = scalar_lea.hbm %s868_s0, 16 }
  0x1a   : > { %s885_s29 = scalar_select %p715_p6, 1, 0 }
  0x1b   : > { %p464_p5 = scmp.ne.s32.totalorder %s868_s0, %s463_s5  ;;  %p465_p10 = pneg %p710_p2 }
  0x1c   : > { %p470_p0 = scmp.lt.u32.totalorder %s463_s5, %s868_s0 }
  0x1d   : > { %p466_p11 = pnand %p465_p10, %p464_p5 }
  0x1f   : > { %p467_p1 = pneg %p466_p11 }
  0x21   : > { %p472_p12 = pnand %p470_p0, %p467_p1 }
  0x23   : > { %475 = shalt.err (!%p472_p12)
}
  0x24   : > { %s476_s16 = scalar_lea.vmem %s127_s25, 16  ;;  %s483_s19 = scalar_lea.vmem %s127_s25, 32 }
  0x25   : > { %p477_p9 = scmp.ne.s32.totalorder %s127_s25, %s476_s16  ;;  %p484_p3 = scmp.lt.s32.totalorder %s127_s25, %s127_s25 }
  0x26   : > { %p485_p13 = scmp.lt.s32.totalorder %s483_s19, %s476_s16 }
  0x27   : > { %p479_p8 = pnand %p477_p9, %p465_p10 }
  0x28   : > { %p486_p4 = por %p485_p13, %p484_p3 }
  0x29   : > { %p480_p7 = pneg %p479_p8 }
  0x2b   : > { %p487_p6 = pnand %p486_p4, %p480_p7 }
  0x2d   : > { %490 = shalt.err (!%p487_p6)
}
  0x2e   : > { %394 = dma.hbm_to_vmem [thread:$0]  (!%p710_p2), %s868_s0, 16, %s127_s25, [#allocation3]  }
  0x2f   : > { %p886_p8 = scmp.ne.s32.totalorder %s885_s29, 0  ;;  %s368_s4 = sshll.u32 %s137_s30, 6 }
  0x30   : > { %s381_s5 = sshll.u32 %s603_s13, 10  ;;  %s141_s15 = scalar_lea.vmem [#allocation5], %s368_s4 }
  0x31   : > { %s900_s28 = smov (%p886_p8, %s31_s28), 0  ;;  %s748_s8 = scalar_lea.hbm %s869_s1, %s381_s5 }
  0x32   : > { %s56_s27 = ssub.s32 %s603_s13, %s900_s28  ;;  %s150_s25 = sshll.u32 %s141_s15, 4  ;;  %s755_s25 = int_to_ptr.vmem [resolvable:$true] %s150_s25 }
  0x33   : > { %p59_p3 = scmp.eq.s32.totalorder %s56_s27, 0  ;;  %s759_s16 = scalar_lea.sflag [#allocation6], %s137_s30 }
  0x34   : > { %s491_s19 = scalar_lea.hbm %s748_s8, 1024  ;;  %p887_p9 = scmp.ne.s32.totalorder %s883_s26, 0 }
  0x35   : > { %s753_s29 = scalar_select %p59_p3, %s595_s11, %s61_s17  }
  0x36   : > { %p492_p7 = scmp.ne.s32.totalorder %s748_s8, %s491_s19  ;;  %p493_p12 = pneg %p887_p9 }
  0x37   : > { %s496_s4 = scalar_lea.hbm %s869_s1, 2048  ;;  %p497_p2 = scmp.lt.u32.totalorder %s748_s8, %s869_s1 }
  0x38   : > { %p494_p13 = pnand %p493_p12, %p492_p7  ;;  %p498_p6 = scmp.lt.u32.totalorder %s496_s4, %s491_s19 }
  0x39   : > { %p500_p10 = scmp.lt.u32.totalorder %s491_s19, %s748_s8 }
  0x3a   : > { %p495_p4 = pneg %p494_p13  ;;  %p499_p5 = por %p498_p6, %p497_p2 }
  0x3c   : > { %p501_p11 = por %p500_p10, %p499_p5 }
  0x3e   : > { %p502_p1 = pnand %p501_p11, %p495_p4 }
  0x40   : > { %505 = shalt.err (!%p502_p1)
}
  0x41   : > { %s506_s30 = scalar_lea.vmem %s755_s25, 1024  ;;  %s610_s5 = smov [#allocation5]  }
  0x42   : > { %p507_p0 = scmp.ne.s32.totalorder %s755_s25, %s506_s30  ;;  %s511_s6 = sshll.u32 %s610_s5, 4  ;;  %s512_s6 = int_to_ptr.vmem [resolvable:$false] %s511_s6 }
  0x43   : > { %s513_s7 = scalar_lea.vmem %s512_s6, 2048  ;;  %p514_p7 = scmp.lt.s32.totalorder %s755_s25, %s512_s6 }
  0x44   : > { %p509_p8 = pnand %p507_p0, %p493_p12  ;;  %p515_p13 = scmp.lt.s32.totalorder %s513_s7, %s506_s30 }
  0x46   : > { %p510_p3 = pneg %p509_p8  ;;  %p516_p2 = por %p515_p13, %p514_p7 }
  0x48   : > { %p517_p6 = pnand %p516_p2, %p510_p3 }
  0x4a   : > { %520 = shalt.err (!%p517_p6)
}
  0x4b   : > { %s611_s15 = smov 128   ;;  %s612_s19 = smov 8  }
  0x4c   : > { %398 = dma.hbm_to_vmem [thread:$0]  (!%p887_p9), %s748_s8, 1024, %s755_s25, %s759_s16, %s611_s15, %s611_s15, %s612_s19  }
  0x4d   : > { %p888_p12 = scmp.ne.s32.totalorder %s882_s23, 0 }
  0x4e   : > { %p889_p4 = scmp.ne.s32.totalorder (!%p888_p12), %s877_s18, 0 }
  0x4f   : > { %162 = sbr.rel (%p888_p12) target bundleno = 359 (0x167), region = 28 }
  0x56   : > { %574 = dma.done.wait (%p889_p4), [#allocation3], 16  }
  0x57   : > { %576 = vsyncadd (%p889_p4), [#allocation3], 4294967280  ;;  %s794_s24 = sand.u32 1, %s591_s10   ;;  %p890_p9 = scmp.ne.s32.totalorder %s879_s20, 0 }
  0x58   : > { %s373_s3 = sshll.u32 %s794_s24, 6  ;;  %s169_s4 = scalar_lea.sflag [#allocation6], %s794_s24 }
  0x59   : > { %s798_s27 = scalar_lea.vmem [#allocation5], %s373_s3 }
  0x5a   : > { %578 = dma.done.wait (%p890_p9), %s169_s4, 1024  }
  0x5b   : > { %580 = vsyncadd (%p890_p9), %s169_s4, 4294966272  ;;  %v201_v0 = vld [vmem:[%s798_s27 + $0x30] sm:$0xff]  ;;  %v199_v1 = vld [vmem:[%s798_s27 + $0x20] sm:$0xff]  ;;  %s613_s18 = smov 64   ;;  %vm224_vm1 = vcmask 523264   ;;  %s374_s20 = sshll.u32 %s794_s24, 5 }
  0x5c   : > { %216 = vrot.lane.b32.xlu1 %v201_v0, %s613_s18  ;;  %212 = vrot.lane.b32.xlu0 %v199_v1, %s613_s18  ;;  %v375_v2 = vld [vmem:[#allocation2] ss:$0 sm:$0xff]  ;;  %v200_v4 = vld [vmem:[%s798_s27 + $0x28] sm:$0xff]  ;;  %v195_v7 = vld [vmem:[%s798_s27] sm:$0xff]  ;;  %s192_s23 = scalar_lea.vmem [#allocation7], %s374_s20  ;;  %s382_s8 = sshll.u32 %s599_s12, 9 }
  0x5d   : > { %v202_v3 = vld [vmem:[%s798_s27 + $0x38] sm:$0xff]  ;;  %vm229_vm0 = vcmp.lt.s32.totalorder %v375_v2, 0  ;;  %v230_v5 = vadd.s32 128, %v375_v2  ;;  %v196_v11 = vld [vmem:[%s798_s27 + $0x8] sm:$0xff]  ;;  %v197_v17 = vld [vmem:[%s798_s27 + $0x10] sm:$0xff]  ;;  %s264_s26 = sshll.u32 %s192_s23, 4  ;;  %s819_s17 = scalar_lea.hbm %s870_s2, %s382_s8  ;;  %s814_s26 = int_to_ptr.vmem [resolvable:$true] %s264_s26 }
  0x5e   : > { %v198_v12 = vld [vmem:[%s798_s27 + $0x18] sm:$0xff]  ;;  %s249_s30 = scalar_lea.sflag [#allocation4], %s794_s24  ;;  %s521_s5 = scalar_lea.vmem %s814_s26, 512 }
  0x5f   : > { %v231_v6 = vsel %vm229_vm0, %v230_v5, %v375_v2  ;;  %p522_p5 = scmp.ne.s32.totalorder %s814_s26, %s521_s5  ;;  %p891_p10 = scmp.ne.s32.totalorder %s880_s21, 0 }
  0x60   : > { %218 = vrot.lane.b32.xlu1 %v202_v3, %s613_s18  ;;  %214 = vrot.lane.b32.xlu0 %v200_v4, %s613_s18  ;;  %s614_s12 = smov [#allocation7]  }
  0x61   : > { %461 = vset.pattern.permute.xlu0 %v231_v6  ;;  %462 = vset.pattern.permute.xlu1 %v231_v6  ;;  %p523_p11 = pnand %p522_p5, %p891_p10  ;;  %s525_s6 = sshll.u32 %s614_s12, 4  ;;  %s526_s6 = int_to_ptr.vmem [resolvable:$false] %s525_s6 }
  0x62   : > { %s527_s7 = scalar_lea.vmem %s526_s6, 1024  ;;  %p528_p0 = scmp.lt.s32.totalorder %s814_s26, %s526_s6 }
  0x63   : > { %p524_p1 = pneg %p523_p11  ;;  %p529_p8 = scmp.lt.s32.totalorder %s527_s7, %s521_s5 }
  0x65   : > { %p530_p3 = por %p529_p8, %p528_p0 }
  0x67   : > { %p531_p7 = pnand %p530_p3, %p524_p1 }
  0xce   : > { %v217_v8 = vpop.permute.xlu1 %216  ;;  %v213_v9 = vpop.permute.xlu0 %212 }
  0xcf   : > { %v225_v10 = vsel %vm224_vm1, %v195_v7, %v213_v9  ;;  %v227_v18 = vsel %vm224_vm1, %v197_v17, %v217_v8 }
  0xd0   : > { %233 = vperm.xlu0 %461, %v225_v10  }
  0xd2   : > { %v219_v13 = vpop.permute.xlu1 %218  ;;  %v215_v14 = vpop.permute.xlu0 %214 }
  0xd3   : > { %v226_v15 = vsel %vm224_vm1, %v196_v11, %v215_v14  ;;  %v228_v16 = vsel %vm224_vm1, %v198_v12, %v219_v13 }
  0xd4   : > { %236 = vperm.xlu1 %462, %v226_v15   ;;  %242 = vperm.xlu0 %461, %v228_v16  }
  0xd8   : > { %239 = vperm.xlu1 %462, %v227_v18  }
 0x14f   : > { %v234_v19 = vpop.permute.xlu0 %233 }
 0x150   : > { %244 = vst [vmem:[%s192_s23] sm:$0xff] %v234_v19 }
 0x153   : > { %v237_v20 = vpop.permute.xlu1 %236  ;;  %v243_v21 = vpop.permute.xlu0 %242 }
 0x154   : > { %245 = vst [vmem:[%s192_s23 + $0x8] sm:$0xff] %v237_v20  ;;  %247 = vst [vmem:[%s192_s23 + $0x18] sm:$0xff] %v243_v21 }
 0x157   : > { %v240_v22 = vpop.permute.xlu1 %239 }
 0x158   : > { %246 = vst [vmem:[%s192_s23 + $0x10] sm:$0xff] %v240_v22 }
 0x159   : > { %534 = shalt.err (!%p531_p7)
}
 0x15a   : > { %s535_s15 = scalar_lea.hbm %s819_s17, 512  ;;  %s539_s4 = scalar_lea.hbm %s870_s2, 1024 }
 0x15b   : > { %p536_p13 = scmp.ne.s32.totalorder %s819_s17, %s535_s15  ;;  %p540_p12 = scmp.lt.u32.totalorder %s819_s17, %s870_s2 }
 0x15c   : > { %p541_p4 = scmp.lt.u32.totalorder %s539_s4, %s535_s15  ;;  %p543_p5 = scmp.lt.u32.totalorder %s535_s15, %s819_s17 }
 0x15d   : > { %p537_p2 = pnand %p536_p13, %p891_p10 }
 0x15e   : > { %p542_p9 = por %p541_p4, %p540_p12 }
 0x15f   : > { %p538_p6 = pneg %p537_p2 }
 0x160   : > { %p544_p11 = por %p543_p5, %p542_p9 }
 0x162   : > { %p545_p1 = pnand %p544_p11, %p538_p6 }
 0x164   : > { %548 = shalt.err (!%p545_p1)
}
 0x165   : > { %s615_s20 = smov 128   ;;  %s616_s23 = smov 8  }
 0x166   : > { %389 = dma.vmem_to_hbm [thread:$0]  (%p891_p10), %s814_s26, 512, %s819_s17, %s249_s30, %s615_s20, %s615_s20, %s616_s23  }
 0x167 PF: > { %s279_s8 = sand.u32 1, %s587_s9   ;;  %p892_p0 = scmp.ne.s32.totalorder %s881_s22, 0 }
 0x168   : > { %p893_p8 = scmp.ge.s32.totalorder %s607_s14, 2  ;;  %s280_s25 = scalar_lea.sflag [#allocation4], %s279_s8 }
 0x16a   : > { %p400_p3 = pnand %p893_p8, %p892_p0 }
 0x16c   : > { %582 = dma.done.wait (!%p400_p3), %s280_s25, 512  }
 0x16d   : > { %584 = vsyncadd (!%p400_p3), %s280_s25, 4294966784  ;;  %s19_s14 = sadd.s32 1, %s607_s14   ;;  %s894_s9 = smov %s591_s10 }
 0x16e   : > { %p16_p7 = scmp.ge.s32.totalorder %s19_s14, 4   ;;  %s895_s10 = smov %s595_s11 }
 0x16f   : > { %s896_s11 = smov %s753_s29  ;;  %s897_s12 = smov %s603_s13 }
 0x170   : > { %s898_s13 = smov %s900_s28  ;;  %18 = sbr.rel (!%p16_p7) target bundleno = 7 (0x7), region = 78 }
 0x177   :  { %285 = vsyncpa [#allocation3], 1 }
 0x178   :  { %287 = vsyncpa [#allocation3 + $0x1], 1 }
 0x179   :  { %288 = vsyncpa [#allocation6], 1 }
 0x17a   :  { %290 = vsyncpa [#allocation6 + $0x1], 1 }
 0x17b   :  { %291 = vsyncpa [#allocation4], 1 }
 0x17c   :  { %293 = vsyncpa [#allocation4 + $0x1], 1 }

</bundles_post_ra>
